<compile_context>
chip_gen: v5e
topology: v5e:2x2
jax: 0.10.0
libtpu: 0.0.40
codegen_flags: <defaults>
</compile_context>

<pallas_src>
import jax
import jax.numpy as jnp
from jax.experimental import pallas as pl
from jax.experimental.pallas import tpu as pltpu

LANES = 128
SUBLANES = 8
MAX_BLOCK_ROWS = 2048   # (2048,128) f32 = 1 MiB per pipeline buffer
NUM_SPLITS = 2          # parallel leading axis -> 2 TCs on v7x, no-op cost on v5e/v6e


def _round_up(x, m):
    return ((x + m - 1) // m) * m


def _sqdiff_partial_kernel(x_ref, t_ref, psum_ref):
    """Accumulate sum((x - t)^2) into a vreg-shaped per-split partial.

    x_ref, t_ref : (BLOCK_ROWS, 128) VMEM tiles of the flattened operands
    psum_ref     : (8, 128) f32 output block; its block index depends only on
                   the parallel axis, so it stays VMEM-resident across the
                   reduction axis and doubles as the accumulator.
    """
    i = pl.program_id(1)  # reduction (arbitrary) axis

    @pl.when(i == 0)
    def _init():
        psum_ref[...] = jnp.zeros_like(psum_ref)

    diff = x_ref[...].astype(jnp.float32) - t_ref[...].astype(jnp.float32)
    sq = diff * diff
    # Fold (BLOCK_ROWS, 128) -> (8, 128): pure VPU vreg adds (reshape matches
    # the native (8,128) tiling, so it is layout-free). The single expensive
    # cross-lane/sublane reduce is deferred to the wrapper, done once.
    psum_ref[...] += sq.reshape(-1, SUBLANES, LANES).sum(axis=0)


def content_loss_forward(x_nchw, target_nchw, weight):
    """Replicates ContentLoss.forward.

    Returns (output, loss):
      output = x_nchw (identity passthrough, as in the PyTorch module)
      loss   = MSE(x * weight, target * weight)
             = weight^2 * mean((x - target)^2)
    """
    total = x_nchw.size
    rows = -(-total // LANES)

    # Tile sizing: big lane-dense blocks, sublane-aligned, split across cores.
    block_rows = min(MAX_BLOCK_ROWS, _round_up(-(-rows // NUM_SPLITS), SUBLANES))
    padded_rows = _round_up(rows, NUM_SPLITS * block_rows)
    steps = padded_rows // (NUM_SPLITS * block_rows)

    pad = padded_rows * LANES - total
    x_flat = x_nchw.reshape(-1)
    t_flat = target_nchw.reshape(-1)
    if pad:
        # Pad both operands identically with zeros: padded (x - t) == 0,
        # so padding contributes nothing to the sum of squares.
        x_flat = jnp.pad(x_flat, (0, pad))
        t_flat = jnp.pad(t_flat, (0, pad))
    x2d = x_flat.reshape(padded_rows, LANES)
    t2d = t_flat.reshape(padded_rows, LANES)

    def in_map(c, i):
        return (c * steps + i, 0)

    partials = pl.pallas_call(
        _sqdiff_partial_kernel,
        out_shape=jax.ShapeDtypeStruct((NUM_SPLITS * SUBLANES, LANES), jnp.float32),
        grid_spec=pltpu.PrefetchScalarGridSpec(
            num_scalar_prefetch=0,
            grid=(NUM_SPLITS, steps),
            in_specs=[
                pl.BlockSpec((block_rows, LANES), in_map),
                pl.BlockSpec((block_rows, LANES), in_map),
            ],
            out_specs=pl.BlockSpec((SUBLANES, LANES), lambda c, i: (c, 0)),
        ),
        compiler_params=pltpu.CompilerParams(
            dimension_semantics=("parallel", "arbitrary"),
        ),
    )(x2d, t2d)

    w = jnp.float32(weight)
    loss = jnp.sum(partials) * (w * w) / jnp.float32(total)

    # forward() returns the input unchanged.
    # TODO(synk): backward()/autograd retention of self.loss is training-side
    # glue with no Pallas forward equivalent; use jax.grad on this function.
    return x_nchw, loss


if __name__ == "__main__":
    key = jax.random.PRNGKey(0)
    k1, k2, k3, k4 = jax.random.split(key, 4)

    # Main check: shapes consistent with the module (NCHW activations).
    N, C, H, W = 2, 4, 16, 16
    x = jax.random.normal(k1, (N, C, H, W), dtype=jnp.float32)
    target = jax.random.normal(k2, (N, C, H, W), dtype=jnp.float32)
    weight = 0.75

    output, loss = content_loss_forward(x, target, weight)
    jax.block_until_ready((output, loss))

    ref_loss = jnp.mean((x * weight - target * weight) ** 2)
    assert jnp.allclose(loss, ref_loss, rtol=1e-5, atol=1e-6), (loss, ref_loss)
    assert jnp.array_equal(output, x)

    # Secondary check: irregular shape exercising the zero-pad path.
    x2 = jax.random.normal(k3, (1, 3, 13, 7), dtype=jnp.float32)
    t2 = jax.random.normal(k4, (1, 3, 13, 7), dtype=jnp.float32)
    out2, loss2 = content_loss_forward(x2, t2, weight)
    jax.block_until_ready((out2, loss2))
    ref2 = jnp.mean((x2 * weight - t2 * weight) ** 2)
    assert jnp.allclose(loss2, ref2, rtol=1e-5, atol=1e-6), (loss2, ref2)
    assert jnp.array_equal(out2, x2)

    print("KERNEL_OK")
</pallas_src>

<mosaic_0001>
module attributes {stable_mosaic.version = 11 : i64} {
  func.func @_sqdiff_partial_kernel(%arg0: i32, %arg1: i32, %arg2: memref<8x128xf32, #tpu.memory_space<vmem>>, %arg3: memref<8x128xf32, #tpu.memory_space<vmem>>, %arg4: memref<8x128xf32, #tpu.memory_space<vmem>>) attributes {dimension_semantics = [#tpu.dimension_semantics<parallel>, #tpu.dimension_semantics<arbitrary>], iteration_bounds = array<i64: 2, 1>, scalar_prefetch = 0 : i64, scratch_operands = 0 : i64, tpu.core_type = #tpu.core_type<tc>, window_params = [{transform_indices = @transform_0, window_bounds = array<i64: 8, 128>}, {transform_indices = @transform_1, window_bounds = array<i64: 8, 128>}, {transform_indices = @transform_2, window_bounds = array<i64: 8, 128>}]} {
    %c0_i32 = arith.constant 0 : i32
    %0 = arith.cmpi eq, %arg1, %c0_i32 : i32
    %1 = arith.extui %0 : i1 to i32
    %c0_i32_0 = arith.constant 0 : i32
    %2 = arith.cmpi ne, %1, %c0_i32_0 : i32
    scf.if %2 {
      %cst_8 = arith.constant 0.000000e+00 : f32
      %12 = vector.broadcast %cst_8 : f32 to vector<8x128xf32>
      %c0_9 = arith.constant 0 : index
      %c0_10 = arith.constant 0 : index
      %13 = vector.load %arg4[%c0_9, %c0_10] : memref<8x128xf32, #tpu.memory_space<vmem>>, vector<8x128xf32>
      tpu.vector_store %arg4[%c0_9, %c0_10], %12 {strides = array<i32>} : memref<8x128xf32, #tpu.memory_space<vmem>>, vector<8x128xf32>,
    } else {
    }
    %c0 = arith.constant 0 : index
    %c0_1 = arith.constant 0 : index
    %3 = vector.load %arg2[%c0, %c0_1] : memref<8x128xf32, #tpu.memory_space<vmem>>, vector<8x128xf32>
    %c0_2 = arith.constant 0 : index
    %c0_3 = arith.constant 0 : index
    %4 = vector.load %arg3[%c0_2, %c0_3] : memref<8x128xf32, #tpu.memory_space<vmem>>, vector<8x128xf32>
    %5 = arith.subf %3, %4 : vector<8x128xf32>
    %6 = arith.mulf %5, %5 : vector<8x128xf32>
    %c0_4 = arith.constant 0 : index
    %c0_5 = arith.constant 0 : index
    %7 = vector.load %arg4[%c0_4, %c0_5] : memref<8x128xf32, #tpu.memory_space<vmem>>, vector<8x128xf32>
    %8 = vector.shape_cast %6 : vector<8x128xf32> to vector<1x8x128xf32>
    %cst = arith.constant dense<0.000000e+00> : vector<8x128xf32>
    %9 = vector.multi_reduction <add>, %8, %cst [0] : vector<1x8x128xf32> to vector<8x128xf32>
    %10 = arith.addf %7, %9 : vector<8x128xf32>
    %c0_6 = arith.constant 0 : index
    %c0_7 = arith.constant 0 : index
    %11 = vector.load %arg4[%c0_6, %c0_7] : memref<8x128xf32, #tpu.memory_space<vmem>>, vector<8x128xf32>
    tpu.vector_store %arg4[%c0_6, %c0_7], %10 {strides = array<i32>} : memref<8x128xf32, #tpu.memory_space<vmem>>, vector<8x128xf32>,
    return
  }
  func.func @transform_0(%arg0: i32, %arg1: i32) -> (i32, i32) {
    %c1_i32 = arith.constant 1 : i32
    %0 = arith.muli %arg0, %c1_i32 : i32
    %1 = arith.addi %0, %arg1 : i32
    %c0_i32 = arith.constant 0 : i32
    %c0_i32_0 = arith.constant 0 : i32
    return %1, %c0_i32 : i32, i32
  }
  func.func @transform_1(%arg0: i32, %arg1: i32) -> (i32, i32) {
    %c1_i32 = arith.constant 1 : i32
    %0 = arith.muli %arg0, %c1_i32 : i32
    %1 = arith.addi %0, %arg1 : i32
    %c0_i32 = arith.constant 0 : i32
    %c0_i32_0 = arith.constant 0 : i32
    return %1, %c0_i32 : i32, i32
  }
  func.func @transform_2(%arg0: i32, %arg1: i32) -> (i32, i32) {
    %c0_i32 = arith.constant 0 : i32
    %c0_i32_0 = arith.constant 0 : i32
    return %arg0, %c0_i32 : i32, i32
  }
}

</mosaic_0001>

<bundles_post_ra>
// kernel: tpu_custom_call.1
= control target key start
LH: loop header
LB: loop body
LE: loop exit
PB: predicated region body
PF: predicated region fallthrough
CT: control target
= control target key end

     0   :  { %7 = vsyncpa [#allocation3], 0  ;;  %s727_s0 = inlined_call_operand.hbm [shape: f32[16,128], index: 0, kind: input, shape index: {}]   ;;  %s728_s1 = inlined_call_operand.hbm [shape: f32[16,128], index: 1, kind: input, shape index: {}]   ;;  %s729_s2 = inlined_call_operand.hbm [shape: f32[16,128], index: 2, kind: output, shape index: {}]  }
   0x1   :  { %9 = vsyncpa [#allocation3 + $0x1], 0 }
   0x2   :  { %10 = vsyncpa [#allocation6], 0 }
   0x3   :  { %12 = vsyncpa [#allocation6 + $0x1], 0 }
   0x4   :  { %13 = vsyncpa [#allocation4], 0 }
   0x5   :  { %15 = vsyncpa [#allocation4 + $0x1], 0  ;;  %s599_s9 = smov 0   ;;  %s601_s10 = smov 0  }
   0x6   :  { %s603_s11 = smov 0   ;;  %s605_s12 = smov 0  }
   0x7   :  { %s607_s13 = smov 0   ;;  %s609_s14 = smov 0  }
   0x8 LB: > { %s352_s15 = sadd.s32 4294967295, %s582_s14   ;;  %s353_s16 = sadd.s32 4294967294, %s582_s14   ;;  %s582_s14 = sphi %s609_s14, %s21_s14   ;;  %s578_s13 = sphi %s607_s13, %s738_s13   ;;  %s574_s12 = sphi %s605_s12, %s737_s12   ;;  %s570_s11 = sphi %s603_s11, %s736_s11   ;;  %s566_s10 = sphi %s601_s10, %s735_s10   ;;  %s562_s9 = sphi %s599_s9, %s734_s9  }
   0x9   : > { %s33_s17 = sadd.s32 1, %s578_s13  ;;  %s42_s18 = sadd.s32 1, %s570_s11 }
   0xa   : > { %p35_p0 = scmp.ge.s32.totalorder %s33_s17, 2  ;;  %p49_p1 = scmp.ne.s32.totalorder %s570_s11, %s566_s10 }
   0xb   : > { %p50_p2 = scmp.eq.s32.totalorder %s582_s14, 0  ;;  %p55_p3 = scmp.ne.s32.totalorder %s566_s10, %s562_s9 }
   0xc   : > { %s740_s17 = smov (%p35_p0, %s33_s17), 0  ;;  %p56_p5 = scmp.eq.s32.totalorder %s352_s15, 0 }
   0xd   : > { %p640_p4 = por %p50_p2, %p49_p1  ;;  %s39_s20 = ssub.s32 %s578_s13, %s740_s17 }
   0xe   : > { %p107_p6 = scmp.eq.s32.totalorder %s352_s15, 1  ;;  %p40_p7 = scmp.eq.s32.totalorder %s39_s20, 0 }
   0xf   : > { %p646_p8 = por %p56_p5, %p55_p3  ;;  %p113_p10 = scmp.eq.s32.totalorder %s353_s16, 1 }
  0x10   : > { %p650_p9 = por %p107_p6, %p49_p1  ;;  %p355_p12 = scmp.ge.s32.totalorder %s582_s14, 2 }
  0x11   : > { %s655_s23 = scalar_select %p40_p7, %s570_s11, %s42_s18  }
  0x12   : > { %p657_p11 = por %p113_p10, %p55_p3  ;;  %p385_p13 = scmp.lt.s32.totalorder %s582_s14, 2 }
  0x13   : > { %s133_s25 = sand.u32 1, %s570_s11   ;;  %s357_s27 = sshll.u32 %s578_s13, 3 }
  0x14   : > { %s356_s26 = sshll.u32 %s133_s25, 3  ;;  %s142_s30 = scalar_lea.hbm %s727_s0, %s357_s27 }
  0x15   : > { %s137_s3 = scalar_lea.vmem [#allocation2], %s356_s26  ;;  %s144_s5 = sshll.u32 %s142_s30, 4  ;;  %s145_s5 = int_to_ptr.hbm [resolvable:$true] %s144_s5 }
  0x16   : > { %s146_s4 = sshll.u32 %s137_s3, 4  ;;  %p375_p0 = pnand %p385_p13, %p640_p4  ;;  %s147_s4 = int_to_ptr.vmem [resolvable:$true] %s146_s4 }
  0x17   : > { %p360_p1 = scmp.ge.s32.totalorder %s582_s14, 1  ;;  %p171_p2 = scmp.lt.s32.totalorder %s582_s14, 3 }
  0x18   : > { %s134_s6 = scalar_lea.sflag [#allocation3], %s133_s25  ;;  %s162_s15 = scalar_lea.hbm %s728_s1, %s357_s27 }
  0x19   : > { %377 = dma.hbm_to_vmem [thread:$0]  (!%p375_p0), %s145_s5, 128, %s147_s4, %s134_s6  }
  0x1a   : > { %p172_p3 = pnand %p360_p1, %p171_p2  ;;  %s157_s16 = scalar_lea.vmem [#allocation5], %s356_s26 }
  0x1b   : > { %s166_s18 = sshll.u32 %s157_s16, 4  ;;  %s164_s20 = sshll.u32 %s162_s15, 4  ;;  %s167_s18 = int_to_ptr.vmem [resolvable:$true] %s166_s18  ;;  %s165_s20 = int_to_ptr.hbm [resolvable:$true] %s164_s20 }
  0x1c   : > { %s154_s28 = scalar_lea.sflag [#allocation6], %s133_s25  ;;  %175 = sbr.rel (%p172_p3) target bundleno = 51 (0x33), region = 28 }
  0x1d   : > { %380 = dma.hbm_to_vmem [thread:$0]  (!%p375_p0), %s165_s20, 128, %s167_s18, %s154_s28  }
  0x1e   : > { %s676_s19 = sand.u32 (!%p172_p3), 1, %s566_s10  }
  0x1f   : > { %s361_s29 = sshll.u32 (!%p172_p3), %s676_s19, 3  ;;  %s178_s30 = scalar_lea.sflag (!%p172_p3), [#allocation3], %s676_s19 }
  0x20   : > { %s181_s3 = scalar_lea.vmem (!%p172_p3), [#allocation2], %s361_s29 }
  0x21   : > { %549 = dma.done.wait (%p646_p8), %s178_s30, 128  }
  0x22   : > { %551 = vsyncadd (%p646_p8), %s178_s30, 4294967168  ;;  %s188_s26 = scalar_lea.sflag [#allocation6], %s676_s19  ;;  %s191_s25 = scalar_lea.vmem [#allocation5], %s361_s29 }
  0x23   : > { %553 = dma.done.wait (%p646_p8), %s188_s26, 128  }
  0x24   : > { %555 = vsyncadd (%p646_p8), %s188_s26, 4294967168  ;;  %s365_s27 = sshll.u32 %s574_s12, 3  ;;  %v225_v0 = vld [vmem:[%s181_s3] sm:$0xff]  ;;  %v226_v1 = vld [vmem:[%s191_s25] sm:$0xff]  ;;  %s217_s7 = scalar_lea.vmem [#allocation7], %s361_s29 }
  0x25   : > { %s244_s6 = scalar_lea.hbm %s729_s2, %s365_s27  ;;  %v227_v2 = vsub.f32 %v225_v0, %v226_v1  ;;  %s246_s8 = sshll.u32 %s217_s7, 4  ;;  %s247_s8 = int_to_ptr.vmem [resolvable:$true] %s246_s8 }
  0x26   : > { %s248_s15 = sshll.u32 %s244_s6, 4  ;;  %s234_s21 = scalar_lea.sflag [#allocation4], %s676_s19  ;;  %s249_s15 = int_to_ptr.hbm [resolvable:$true] %s248_s15 }
  0x27   : > { %v228_v3 = vmul.f32 %v227_v2, %v227_v2  ;;  %s510_s16 = sshra.s32 %s249_s15, 4  ;;  %s516_s28 = scalar_lea.hbm %s729_s2, 16  ;;  %s511_s16 = int_to_ptr.hbm [resolvable:$true] %s510_s16 }
  0x28   : > { %s512_s18 = scalar_lea.hbm %s511_s16, 8  ;;  %p517_p7 = scmp.lt.s32.totalorder %s511_s16, %s729_s2 }
  0x29   : > { %232 = vst [vmem:[%s217_s7] sm:$0xff] %v228_v3  ;;  %p513_p4 = scmp.ne.s32.totalorder %s511_s16, %s512_s18  ;;  %p518_p8 = scmp.lt.s32.totalorder %s516_s28, %s512_s18 }
  0x2b   : > { %p514_p5 = pnand %p513_p4, %p650_p9  ;;  %p519_p10 = por %p518_p8, %p517_p7 }
  0x2d   : > { %p515_p6 = pneg %p514_p5 }
  0x2f   : > { %p520_p13 = pnand %p519_p10, %p515_p6 }
  0x31   : > { %523 = shalt.err (!%p520_p13)
}
  0x32   : > { %372 = dma.vmem_to_hbm [thread:$0]  (%p650_p9), %s247_s8, 128, %s249_s15, %s234_s21  }
  0x33 PF: > { %s260_s19 = sand.u32 1, %s562_s9   ;;  %p382_p0 = pnand %p355_p12, %p657_p11 }
  0x34   : > { %s261_s3 = scalar_lea.sflag [#allocation4], %s260_s19 }
  0x35   : > { %p383_p1 = pneg %p382_p0 }
  0x37   : > { %557 = dma.done.wait (%p383_p1), %s261_s3, 128  }
  0x38   : > { %559 = vsyncadd (%p383_p1), %s261_s3, 4294967168  ;;  %s21_s14 = sadd.s32 1, %s582_s14   ;;  %s734_s9 = smov %s566_s10 }
  0x39   : > { %p18_p2 = scmp.ge.s32.totalorder %s21_s14, 4   ;;  %s735_s10 = smov %s570_s11 }
  0x3a   : > { %s736_s11 = smov %s655_s23  ;;  %s737_s12 = smov %s578_s13 }
  0x3b   : > { %s738_s13 = smov %s740_s17  ;;  %20 = sbr.rel (!%p18_p2) target bundleno = 8 (0x8), region = 90 }
  0x40   :  { %267 = vsyncpa [#allocation3], 1 }
  0x41   :  { %269 = vsyncpa [#allocation3 + $0x1], 1 }
  0x42   :  { %270 = vsyncpa [#allocation6], 1 }
  0x43   :  { %272 = vsyncpa [#allocation6 + $0x1], 1 }
  0x44   :  { %273 = vsyncpa [#allocation4], 1 }
  0x45   :  { %275 = vsyncpa [#allocation4 + $0x1], 1 }

</bundles_post_ra>
